<compile_context>
chip_gen: v7x
topology: tpu7x:2x2x1
jax: 0.10.0
libtpu: 0.0.40
codegen_flags: <defaults>
</compile_context>

<pallas_src>
import functools

import jax
import jax.numpy as jnp
import numpy as np
from jax import lax
from jax.experimental import pallas as pl
from jax.experimental.pallas import tpu as pltpu


def _grit_kernel(bbox_ref, wa_ref, wc_ref, bf_ref, w2t_ref, b2_ref, out_ref,
                 *, BB, P, H2):
    """One grid step: BB batch elements -> (Cp, BB*P*P) transposed logits."""
    D = bbox_ref.shape[-1]
    x = bbox_ref[...].reshape(BB * P, D)                                  # bf16

    # Fused stage 1+2 (W1 hoisted through the broadcast-add):
    #   h[b,i,j] = LeakyReLU( x[b,i] @ A + x[b,j] @ Cm + b_fused )
    u = jnp.dot(x, wa_ref[...], preferred_element_type=jnp.float32)       # (BB*P, H2)
    v = jnp.dot(x, wc_ref[...], preferred_element_type=jnp.float32) + bf_ref[...]

    h = u.reshape(BB, P, 1, H2) + v.reshape(BB, 1, P, H2)                 # (BB,P,P,H2) f32
    h = jnp.where(h > 0, h, 0.01 * h)                                     # LeakyReLU(0.01)
    h = h.reshape(BB * P * P, H2).astype(jnp.bfloat16)                    # (rows, H2)

    # Stage 3 transposed: (Cp, H2) . (rows, H2)^T -> (Cp, rows); pair axis on
    # lanes -> single lane-dense store, minimal HBM bytes for small num_class.
    o_t = lax.dot_general(w2t_ref[...], h,
                          dimension_numbers=(((1,), (1,)), ((), ())),
                          preferred_element_type=jnp.float32)
    o_t = o_t + b2_ref[...]                                               # (Cp, 1) bias
    out_ref[...] = o_t.astype(out_ref.dtype)


def _pick_bb(B, P, H2, Cp, D):
    """Choose how many batch elements to fold per grid step.

    Targets 512-2048 pair rows per step under a ~12 MiB VMEM budget, keeps the
    lane-dense transposed output block (Cp, BB*P*P) legal (lane dim % 128 == 0
    or full array), and prefers grid >= 2 on the parallel axis (v7x megacore).
    """
    PP = P * P
    bpr = H2 * 10 + Cp * 12 + max(1, (P * D * 4) // PP)   # ~live bytes / pair row
    budget = 12 << 20
    row_target = 1024
    divs = [d for d in range(1, B + 1) if B % d == 0]
    valid = [d for d in divs if d == B or (d * PP) % 128 == 0]
    within = [d for d in valid if d * PP * bpr <= budget] or [valid[0]]
    reach = [d for d in within if d * PP >= min(row_target, B * PP)]
    bb = min(reach) if reach else max(within)
    if B // bb < 2:                       # shard across two TensorCores if cheap
        alts = [d for d in within if B // d >= 2]
        if alts and max(alts) * PP * 2 >= min(row_target, bb * PP):
            bb = max(alts)
    return bb


@jax.jit
def grit_forward(bbox_emb, w_roi, b_roi, w1, b1, w2, b2):
    """bbox_emb: (B, P, D) float32. Weights in PyTorch (out, in) convention."""
    B, P, D = bbox_emb.shape
    H2 = w1.shape[0]
    C = w2.shape[0]
    Cp = ((C + 7) // 8) * 8               # classifier rows padded to a sublane tile
    PP = P * P

    BB = _pick_bb(B, P, H2, Cp, D)
    rows = BB * PP

    # Weight fusion in f32 (traced once under jit); bf16 MXU operands.
    wa = w_roi[:, :D].T @ w1.T                                  # (D, H2)
    wc = w_roi[:, D:].T @ w1.T                                  # (D, H2)
    b_fused = (b_roi @ w1.T + b1).reshape(1, H2).astype(jnp.float32)
    w2t = jnp.zeros((Cp, H2), jnp.float32).at[:C].set(w2)       # (Cp, H2)
    b2t = jnp.zeros((Cp, 1), jnp.float32).at[:C, 0].set(b2.astype(jnp.float32))

    bbox_bf = bbox_emb.astype(jnp.bfloat16)
    wa_bf = wa.astype(jnp.bfloat16)
    wc_bf = wc.astype(jnp.bfloat16)
    w2t_bf = w2t.astype(jnp.bfloat16)

    # VMEM footprint estimate -> compiler limit (keeps v7x's 64 MiB safe).
    weights_bytes = (2 * D * H2 + Cp * H2) * 2 + (H2 + Cp) * 4
    est_vmem = (2 * BB * P * D * 2            # input, double-buffered bf16
                + 2 * Cp * rows * 4           # output, double-buffered f32
                + rows * H2 * 10              # f32/bf16 temporaries
                + weights_bytes)
    vmem_limit = int(min(56 << 20, max(32 << 20, 2 * est_vmem)))

    flops = (2 * B * P * D * (2 * H2)         # fused stage-1/2 projections
             + 3 * B * PP * H2                # broadcast add + LeakyReLU
             + 2 * B * PP * H2 * Cp)          # classifier GEMM
    bytes_accessed = B * P * D * 2 + weights_bytes + Cp * B * PP * 4

    kernel = functools.partial(_grit_kernel, BB=BB, P=P, H2=H2)
    const2 = lambda g: (0, 0)

    out_t = pl.pallas_call(
        kernel,
        out_shape=jax.ShapeDtypeStruct((Cp, B * PP), jnp.float32),
        grid=(B // BB,),
        in_specs=[
            pl.BlockSpec((BB, P, D), lambda g: (g, 0, 0)),   # bbox_emb (bf16)
            pl.BlockSpec((D, H2), const2),                   # A  = W_row^T W1^T
            pl.BlockSpec((D, H2), const2),                   # Cm = W_col^T W1^T
            pl.BlockSpec((1, H2), const2),                   # fused bias (f32)
            pl.BlockSpec((Cp, H2), const2),                  # W2 padded (bf16)
            pl.BlockSpec((Cp, 1), const2),                   # b2 padded (f32)
        ],
        out_specs=pl.BlockSpec((Cp, rows), lambda g: (0, g)),
        compiler_params=pltpu.CompilerParams(
            dimension_semantics=("parallel",),
            vmem_limit_bytes=vmem_limit),
        cost_estimate=pl.CostEstimate(
            flops=flops, transcendentals=0, bytes_accessed=bytes_accessed),
    )(bbox_bf, wa_bf, wc_bf, b_fused, w2t_bf, b2t)

    # (Cp, B*P*P) -> (B, P*P, num_class); only the C useful rows are read back.
    return out_t[:C].T.reshape(B, PP, C)


def grit_reference(bbox_emb, w_roi, b_roi, w1, b1, w2, b2):
    """Pure-JAX f32 mirror of the PyTorch forward (remove_gcn / remove_transformer)."""
    B, P, D = bbox_emb.shape
    row = jnp.repeat(bbox_emb[:, :, None, :], P, axis=2)     # (B,P,P,D)
    col = jnp.repeat(bbox_emb[:, None, :, :], P, axis=1)     # (B,P,P,D)
    cat = jnp.concatenate([row, col], axis=-1)               # (B,P,P,2D)
    rel = cat @ w_roi.T + b_roi                               # (B,P,P,H)
    rel = rel.reshape(B, P * P, -1)
    h = rel @ w1.T + b1
    h = jnp.where(h > 0, h, 0.01 * h)
    return h @ w2.T + b2


if __name__ == "__main__":
    # Small, module-consistent shapes.
    B = 2            # batch
    P = 8            # max_person
    D = 32           # backbone_dim
    H = 32           # args.hidden_dim
    H2 = H // 2
    C = 4            # num_class

    key = jax.random.PRNGKey(0)
    k = jax.random.split(key, 8)

    # roi_feature from the (external) backbone — kernel input.
    bbox_emb = jax.random.normal(k[0], (B, P, D), jnp.float32)

    # Deterministic parameter init (PyTorch (out, in) convention).
    w_roi = 0.05 * jax.random.normal(k[1], (H, 2 * D), jnp.float32)
    b_roi = 0.05 * jax.random.normal(k[2], (H,), jnp.float32)
    w1 = 0.05 * jax.random.normal(k[3], (H2, H), jnp.float32)
    b1 = 0.05 * jax.random.normal(k[4], (H2,), jnp.float32)
    w2 = 0.05 * jax.random.normal(k[5], (C, H2), jnp.float32)
    b2 = 0.05 * jax.random.normal(k[6], (C,), jnp.float32)

    out = jax.block_until_ready(
        grit_forward(bbox_emb, w_roi, b_roi, w1, b1, w2, b2))
    ref = jax.block_until_ready(
        grit_reference(bbox_emb, w_roi, b_roi, w1, b1, w2, b2))

    assert out.shape == (B, P * P, C), out.shape
    # bf16 MXU inputs with f32 accumulation -> loosened tolerance vs pure f32;
    # the f32 weight pre-fusion keeps the error below the previous revision's.
    np.testing.assert_allclose(np.asarray(out), np.asarray(ref),
                               rtol=2e-2, atol=1e-2)
    print("KERNEL_OK")
</pallas_src>

<mosaic_0001>
module attributes {stable_mosaic.version = 11 : i64} {
  func.func @_grit_kernel(%arg0: i32, %arg1: memref<2x8x32xbf16, #tpu.memory_space<vmem>>, %arg2: memref<32x16xbf16, #tpu.memory_space<vmem>>, %arg3: memref<32x16xbf16, #tpu.memory_space<vmem>>, %arg4: memref<1x16xf32, #tpu.memory_space<vmem>>, %arg5: memref<8x16xbf16, #tpu.memory_space<vmem>>, %arg6: memref<8x1xf32, #tpu.memory_space<vmem>>, %arg7: memref<8x128xf32, #tpu.memory_space<vmem>>) attributes {dimension_semantics = [#tpu.dimension_semantics<parallel>], iteration_bounds = array<i64: 1>, scalar_prefetch = 0 : i64, scratch_operands = 0 : i64, tpu.core_type = #tpu.core_type<tc>, window_params = [{transform_indices = @transform_0, window_bounds = array<i64: 2, 8, 32>}, {pipeline_mode = #tpu.pipeline_mode<synchronous>, transform_indices = @transform_1, window_bounds = array<i64: 32, 16>}, {pipeline_mode = #tpu.pipeline_mode<synchronous>, transform_indices = @transform_2, window_bounds = array<i64: 32, 16>}, {pipeline_mode = #tpu.pipeline_mode<synchronous>, transform_indices = @transform_3, window_bounds = array<i64: 1, 16>}, {pipeline_mode = #tpu.pipeline_mode<synchronous>, transform_indices = @transform_4, window_bounds = array<i64: 8, 16>}, {pipeline_mode = #tpu.pipeline_mode<synchronous>, transform_indices = @transform_5, window_bounds = array<i64: 8, 1>}, {transform_indices = @transform_6, window_bounds = array<i64: 8, 128>}]} {
    %c0 = arith.constant 0 : index
    %c0_0 = arith.constant 0 : index
    %c0_1 = arith.constant 0 : index
    %0 = vector.load %arg1[%c0, %c0_0, %c0_1] : memref<2x8x32xbf16, #tpu.memory_space<vmem>>, vector<2x8x32xbf16>
    %1 = vector.shape_cast %0 : vector<2x8x32xbf16> to vector<16x32xbf16>
    %c0_2 = arith.constant 0 : index
    %c0_3 = arith.constant 0 : index
    %2 = vector.load %arg2[%c0_2, %c0_3] : memref<32x16xbf16, #tpu.memory_space<vmem>>, vector<32x16xbf16>
    %cst = arith.constant dense<0.000000e+00> : vector<16x16xf32>
    %3 = tpu.matmul %1, %2, %cst {dimension_numbers = #tpu.dot_dimension_numbers<[1], [0], [0], [1], [0, 0, 1, 1], [], []>} : vector<16x32xbf16>, vector<32x16xbf16>, vector<16x16xf32> -> vector<16x16xf32>
    %c0_4 = arith.constant 0 : index
    %c0_5 = arith.constant 0 : index
    %4 = vector.load %arg3[%c0_4, %c0_5] : memref<32x16xbf16, #tpu.memory_space<vmem>>, vector<32x16xbf16>
    %cst_6 = arith.constant dense<0.000000e+00> : vector<16x16xf32>
    %5 = tpu.matmul %1, %4, %cst_6 {dimension_numbers = #tpu.dot_dimension_numbers<[1], [0], [0], [1], [0, 0, 1, 1], [], []>} : vector<16x32xbf16>, vector<32x16xbf16>, vector<16x16xf32> -> vector<16x16xf32>
    %c0_7 = arith.constant 0 : index
    %c0_8 = arith.constant 0 : index
    %6 = vector.load %arg4[%c0_7, %c0_8] : memref<1x16xf32, #tpu.memory_space<vmem>>, vector<1x16xf32>
    %7 = vector.broadcast %6 : vector<1x16xf32> to vector<16x16xf32>
    %8 = arith.addf %5, %7 : vector<16x16xf32>
    %9 = vector.shape_cast %3 : vector<16x16xf32> to vector<2x8x1x16xf32>
    %10 = vector.shape_cast %8 : vector<16x16xf32> to vector<2x1x8x16xf32>
    %11 = vector.broadcast %9 : vector<2x8x1x16xf32> to vector<2x8x8x16xf32>
    %12 = vector.broadcast %10 : vector<2x1x8x16xf32> to vector<2x8x8x16xf32>
    %13 = arith.addf %11, %12 : vector<2x8x8x16xf32>
    %cst_9 = arith.constant 0.000000e+00 : f32
    %14 = vector.broadcast %cst_9 : f32 to vector<2x8x8x16xf32>
    %15 = arith.cmpf ogt, %13, %14 : vector<2x8x8x16xf32>
    %cst_10 = arith.constant 0.00999999977 : f32
    %16 = vector.broadcast %cst_10 : f32 to vector<2x8x8x16xf32>
    %17 = arith.mulf %16, %13 : vector<2x8x8x16xf32>
    %18 = arith.select %15, %13, %17 : vector<2x8x8x16xi1>, vector<2x8x8x16xf32>
    %19 = vector.shape_cast %18 : vector<2x8x8x16xf32> to vector<128x16xf32>
    %20 = arith.truncf %19 : vector<128x16xf32> to vector<128x16xbf16>
    %c0_11 = arith.constant 0 : index
    %c0_12 = arith.constant 0 : index
    %21 = vector.load %arg5[%c0_11, %c0_12] : memref<8x16xbf16, #tpu.memory_space<vmem>>, vector<8x16xbf16>
    %cst_13 = arith.constant dense<0.000000e+00> : vector<8x128xf32>
    %22 = tpu.matmul %21, %20, %cst_13 {dimension_numbers = #tpu.dot_dimension_numbers<[1], [1], [0], [0], [0, 0, 1, 0], [], []>} : vector<8x16xbf16>, vector<128x16xbf16>, vector<8x128xf32> -> vector<8x128xf32>
    %c0_14 = arith.constant 0 : index
    %c0_15 = arith.constant 0 : index
    %23 = vector.load %arg6[%c0_14, %c0_15] : memref<8x1xf32, #tpu.memory_space<vmem>>, vector<8x1xf32>
    %24 = vector.broadcast %23 : vector<8x1xf32> to vector<8x128xf32>
    %25 = arith.addf %22, %24 : vector<8x128xf32>
    %c0_16 = arith.constant 0 : index
    %c0_17 = arith.constant 0 : index
    %26 = vector.load %arg7[%c0_16, %c0_17] : memref<8x128xf32, #tpu.memory_space<vmem>>, vector<8x128xf32>
    tpu.vector_store %arg7[%c0_16, %c0_17], %25 {strides = array<i32>} : memref<8x128xf32, #tpu.memory_space<vmem>>, vector<8x128xf32>,
    return
  }
  func.func @transform_0(%arg0: i32) -> (i32, i32, i32) {
    %c0_i32 = arith.constant 0 : i32
    %c0_i32_0 = arith.constant 0 : i32
    %c0_i32_1 = arith.constant 0 : i32
    return %arg0, %c0_i32, %c0_i32_0 : i32, i32, i32
  }
  func.func @transform_1(%arg0: i32) -> (i32, i32) {
    %c0_i32 = arith.constant 0 : i32
    %c0_i32_0 = arith.constant 0 : i32
    %c0_i32_1 = arith.constant 0 : i32
    return %c0_i32, %c0_i32_0 : i32, i32
  }
  func.func @transform_2(%arg0: i32) -> (i32, i32) {
    %c0_i32 = arith.constant 0 : i32
    %c0_i32_0 = arith.constant 0 : i32
    %c0_i32_1 = arith.constant 0 : i32
    return %c0_i32, %c0_i32_0 : i32, i32
  }
  func.func @transform_3(%arg0: i32) -> (i32, i32) {
    %c0_i32 = arith.constant 0 : i32
    %c0_i32_0 = arith.constant 0 : i32
    %c0_i32_1 = arith.constant 0 : i32
    return %c0_i32, %c0_i32_0 : i32, i32
  }
  func.func @transform_4(%arg0: i32) -> (i32, i32) {
    %c0_i32 = arith.constant 0 : i32
    %c0_i32_0 = arith.constant 0 : i32
    %c0_i32_1 = arith.constant 0 : i32
    return %c0_i32, %c0_i32_0 : i32, i32
  }
  func.func @transform_5(%arg0: i32) -> (i32, i32) {
    %c0_i32 = arith.constant 0 : i32
    %c0_i32_0 = arith.constant 0 : i32
    %c0_i32_1 = arith.constant 0 : i32
    return %c0_i32, %c0_i32_0 : i32, i32
  }
  func.func @transform_6(%arg0: i32) -> (i32, i32) {
    %c0_i32 = arith.constant 0 : i32
    %c0_i32_0 = arith.constant 0 : i32
    return %c0_i32, %arg0 : i32, i32
  }
}

</mosaic_0001>

<bundles_post_ra>
// kernel: grit_forward.1
= control target key start
LH: loop header
LB: loop body
LE: loop exit
PB: predicated region body
PF: predicated region fallthrough
CT: control target
= control target key end

     0   :  { %v558_v0 = vmov 0.0   ;;  %vm559_vm0 = vmmov 0   ;;  %vm47_vm1 = vcmask 261120   ;;  %v560_v6 = vmov 0   ;;  %s692_s1 = inlined_call_operand.vmem [shape: bf16[32,16], index: 1, kind: input, shape index: {}]   ;;  %s693_s0 = inlined_call_operand.vmem [shape: bf16[2,8,32], index: 0, kind: input, shape index: {}]   ;;  %s694_s2 = inlined_call_operand.vmem [shape: bf16[32,16], index: 2, kind: input, shape index: {}]   ;;  %s695_s5 = inlined_call_operand.vmem [shape: f32[8,1], index: 5, kind: input, shape index: {}]   ;;  %s696_s3 = inlined_call_operand.vmem [shape: f32[1,16], index: 3, kind: input, shape index: {}]   ;;  %s697_s4 = inlined_call_operand.vmem [shape: bf16[8,16], index: 4, kind: input, shape index: {}]   ;;  %s698_s6 = inlined_call_operand.vmem [shape: f32[8,128], index: 6, kind: output, shape index: {}]  }
   0x1   :  { %512 = vmatprep.subr.bf16.mxu1 %v558_v0  ;;  %v553_v1 = vld [vmem:[%s692_s1] sm:$0xff]   ;;  %516 = vmatprep.mubr.msk.bf16.mxu1 %vm559_vm0, %v558_v0  ;;  %v554_v2 = vld [vmem:[%s692_s1 + $0x8] sm:$0xff]   ;;  %v561_v8 = vmov 1966171168   ;;  %v162_v10 = vlaneseq  ;;  %vm415_vm2 = vcmask 130048  }
   0x2   :  { %528 = vmatprep.subr.bf16.mxu0 %v558_v0  ;;  %544 = vmatprep.mubr.msk.bf16.mxu0 %vm559_vm0, %v558_v0  ;;  %v555_v3 = vld [vmem:[%s693_s0] sm:$0xff]   ;;  %v557_v5 = vld [vmem:[%s694_s2 + $0x8] sm:$0xff]   ;;  %v160_v9 = vunpack.c.l.s4 %v561_v8 }
   0x3   :  { %513 = vmatpush3.bf16.msra.mxu1 %v553_v1  ;;  %v556_v4 = vld [vmem:[%s694_s2] sm:$0xff]   ;;  %552 = vset.pattern.permute.xlu0 %v560_v6  ;;  %v163_v12 = vshrl.u32 %v162_v10, 7 }
   0x4   :  { %514 = vmatprep.subr.bf16.mxu1 %v558_v0  ;;  %v409_v7 = vld [vmem:[%s695_s5] sm:$0xff]  ;;  %v161_v11 = vunpack.c.0.s8 %v160_v9 }
   0x5   :  { %412 = vperm.xlu0 %552, %v409_v7   ;;  %v626_v24 = vsub.s32 0, %v163_v12  ;;  %v492_v40 = vld [vmem:[%s696_s3] ss:$0 sm:$0xff] }
   0x6   :  { %v164_v13 = vsub.s32 %v161_v11, %v163_v12 }
   0x7   :  { %515 = vmatpush3.bf16.msra.mxu1 %v554_v2 }
   0x8   :  { %520 = vmatprep.subr.bf16.mxu1 %v558_v0 }
   0xa   :  { %517 = vmatmul.mubr.msk.bf16.vlgmr.msra.gmra.mrb[0].mxu1 %vm47_vm1, %v555_v3 }
   0xb   :  { %521 = vmatpush3.bf16.msra.mxu1 %v556_v4  ;;  %524 = vmatprep.mubr.msk.bf16.mxu1 %vm559_vm0, %v558_v0 }
   0xc   :  { %522 = vmatprep.subr.bf16.mxu1 %v558_v0 }
   0xf   :  { %523 = vmatpush3.bf16.msra.mxu1 %v557_v5 }
  0x12   :  { %525 = vmatmul.mubr.msk.bf16.vlgmr.msra.gmra.mrb[4].mxu1 %vm47_vm1, %v555_v3 }
  0xdd   :  { %v85_v14 = vpop.f32.mrb[0].mxu1 }
  0xde   :  { %v158_v15 = vcombine.high %v85_v14, %v85_v14  ;;  %v165_v16 = vrot.slane %v85_v14, %v164_v13  ;;  %v518_v17 = vpop.f32.mrb[1].mxu1 }
  0xdf   :  { %v88_v18 = vpop.f32.mrb[2].mxu1 }
  0xe0   :  { %v172_v19 = vrot.slane %v158_v15, %v164_v13  ;;  %v173_v20 = vcombine.high %v165_v16, %v165_v16  ;;  %v181_v21 = vrot.slane %v165_v16, %v164_v13  ;;  %v207_v22 = vcombine.high %v88_v18, %v88_v18  ;;  %v519_v23 = vpop.f32.mrb[3].mxu1 }
  0xe1   :  { %v214_v25 = vrot.slane %v88_v18, %v164_v13 }
  0xe2   :  { %v174_v26 = vcombine.high %v172_v19, %v172_v19  ;;  %v188_v27 = vrot.slane %v172_v19, %v164_v13  ;;  %v195_v28 = vrot.slane %v173_v20, %v164_v13  ;;  %v203_v29 = vcombine.high %v181_v21, %v181_v21 }
  0xe3   :  { %v221_v30 = vrot.slane %v207_v22, %v164_v13  ;;  %v222_v31 = vcombine.high %v214_v25, %v214_v25  ;;  %v230_v32 = vrot.slane %v214_v25, %v164_v13  ;;  %v259_v36 = vrot.slane %v181_v21, %v626_v24 }
  0xe4   :  { %v202_v33 = vrot.slane %v174_v26, %v164_v13  ;;  %v204_v34 = vcombine.high %v188_v27, %v188_v27  ;;  %v205_v35 = vcombine.high %v195_v28, %v195_v28  ;;  %v263_v37 = vrot.slane %v195_v28, %v626_v24 }
  0xe5   :  { %v223_v38 = vcombine.high %v221_v30, %v221_v30  ;;  %v630_v39 = vrot.slane %v221_v30, %v164_v13  ;;  %v149_v41 = vpop.f32.mrb[4].mxu1  ;;  %v267_v43 = vrot.slane %v203_v29, %v626_v24  ;;  %v275_v45 = vrot.slane %v188_v27, %v626_v24 }
  0xe6   :  { %v206_v42 = vcombine.high %v202_v33, %v202_v33  ;;  %v271_v44 = vrot.slane %v205_v35, %v626_v24  ;;  %v526_v46 = vpop.f32.mrb[5].mxu1  ;;  %v279_v47 = vrot.slane %v202_v33, %v626_v24  ;;  %v244_v48 = vrot.slane %v222_v31, %v164_v13 }
  0xe7   :  { %v639_v49 = vrot.slane %v223_v38, %v164_v13  ;;  %v252_v50 = vcombine.high %v230_v32, %v230_v32  ;;  %v152_v51 = vpop.f32.mrb[6].mxu1  ;;  %v283_v52 = vrot.slane %v204_v34, %v626_v24  ;;  %v253_v53 = vcombine.high %v630_v39, %v630_v39 }
  0xe8   :  { %v291_v54 = vrot.slane %v230_v32, %v626_v24  ;;  %v150_v55 = vadd.f32 %v492_v40, %v149_v41  ;;  %v527_v56 = vpop.f32.mrb[7].mxu1  ;;  %v254_v57 = vcombine.high %v244_v48, %v244_v48  ;;  %v307_v59 = vrot.slane %v630_v39, %v626_v24 }
  0xe9   :  { %v255_v58 = vcombine.high %v639_v49, %v639_v49  ;;  %v649_v60 = vadd.f32 %v492_v40, %v152_v51  ;;  %v295_v61 = vrot.slane %v244_v48, %v626_v24  ;;  %v299_v62 = vrot.slane %v252_v50, %v626_v24 }
  0xea   :  { %v336_v63 = vadd.f32 %v259_v36, %v150_v55  ;;  %v337_v1 = vadd.f32 %v263_v37, %v150_v55  ;;  %v311_v2 = vrot.slane %v639_v49, %v626_v24  ;;  %v338_v3 = vadd.f32 %v267_v43, %v150_v55 }
  0xeb   :  { %v339_v4 = vadd.f32 %v271_v44, %v150_v55  ;;  %v340_v5 = vadd.f32 %v275_v45, %v150_v55  ;;  %v341_v12 = vadd.f32 %v279_v47, %v150_v55  ;;  %v287_v19 = vrot.slane %v206_v42, %v626_v24 }
  0xec   :  { %vm352_vm3 = vcmp.gt.f32.partialorder %v336_v63, 0.0  ;;  %vm353_vm4 = vcmp.gt.f32.partialorder %v337_v1, 0.0  ;;  %v368_v6 = vmul.f32 0.01, %v336_v63  ;;  %v369_v7 = vmul.f32 0.01, %v337_v1 }
  0xed   :  { %vm354_vm5 = vcmp.gt.f32.partialorder %v338_v3, 0.0  ;;  %vm355_vm6 = vcmp.gt.f32.partialorder %v339_v4, 0.0  ;;  %v370_v8 = vmul.f32 0.01, %v338_v3  ;;  %v371_v9 = vmul.f32 0.01, %v339_v4 }
  0xee   :  { %v384_v10 = vsel %vm352_vm3, %v336_v63, %v368_v6  ;;  %v385_v11 = vsel %vm353_vm4, %v337_v1, %v369_v7  ;;  %vm356_vm7 = vcmp.gt.f32.partialorder %v340_v5, 0.0  ;;  %v372_v16 = vmul.f32 0.01, %v340_v5  ;;  %v408_v6 = vld [vmem:[%s697_s4] sm:$0xf]  ;;  %v413_v7 = vpop.permute.xlu0 %412 }
  0xef   :  { %v400_v13 = vpack.c.bf16 %v385_v11, %v384_v10  ;;  %v386_v14 = vsel %vm354_vm5, %v338_v3, %v370_v8  ;;  %v387_v15 = vsel %vm355_vm6, %v339_v4, %v371_v9  ;;  %vm357_vm8 = vcmp.gt.f32.partialorder %v341_v12, 0.0 }
  0xf0   :  { %v401_v17 = vpack.c.bf16 %v387_v15, %v386_v14  ;;  %v373_v18 = vmul.f32 0.01, %v341_v12  ;;  %v388_v21 = vsel %vm356_vm7, %v340_v5, %v372_v16  ;;  %v342_v22 = vadd.f32 %v283_v52, %v150_v55 }
  0xf1   :  { %v420_v20 = vsel %vm415_vm2, %v400_v13, 0  ;;  %v344_v23 = vadd.f32 %v291_v54, %v649_v60  ;;  %v303_v25 = vrot.slane %v254_v57, %v626_v24  ;;  %v343_v27 = vadd.f32 %v287_v19, %v150_v55 }
  0xf2   :  { %529 = vmatpush3.bf16.xpose.msra.mxu0 %v420_v20  ;;  %v389_v26 = vsel %vm357_vm8, %v341_v12, %v373_v18  ;;  %v345_v28 = vadd.f32 %v295_v61, %v649_v60  ;;  %vm358_vm9 = vcmp.gt.f32.partialorder %v342_v22, 0.0  ;;  %v374_v30 = vmul.f32 0.01, %v342_v22 }
  0xf3   :  { %530 = vmatprep.subr.bf16.mxu0 %v558_v0  ;;  %v402_v29 = vpack.c.bf16 %v389_v26, %v388_v21  ;;  %vm360_vm10 = vcmp.gt.f32.partialorder %v344_v23, 0.0  ;;  %vm359_vm11 = vcmp.gt.f32.partialorder %v343_v27, 0.0  ;;  %v375_v31 = vmul.f32 0.01, %v343_v27 }
  0xf4   :  { %vm361_vm12 = vcmp.gt.f32.partialorder %v345_v28, 0.0  ;;  %v376_v32 = vmul.f32 0.01, %v344_v23  ;;  %v315_v33 = vrot.slane %v253_v53, %v626_v24  ;;  %v390_v34 = vsel %vm358_vm9, %v342_v22, %v374_v30 }
  0xf5   :  { %v377_v35 = vmul.f32 0.01, %v345_v28  ;;  %v346_v36 = vadd.f32 %v299_v62, %v649_v60  ;;  %v391_v37 = vsel %vm359_vm11, %v343_v27, %v375_v31  ;;  %v347_v39 = vadd.f32 %v303_v25, %v649_v60 }
  0xf6   :  { %v392_v38 = vsel %vm360_vm10, %v344_v23, %v376_v32  ;;  %v348_v40 = vadd.f32 %v307_v59, %v649_v60  ;;  %v403_v41 = vpack.c.bf16 %v391_v37, %v390_v34  ;;  %v349_v46 = vadd.f32 %v311_v2, %v649_v60 }
  0xf7   :  { %v393_v42 = vsel %vm361_vm12, %v345_v28, %v377_v35  ;;  %vm362_vm13 = vcmp.gt.f32.partialorder %v346_v36, 0.0  ;;  %v378_v43 = vmul.f32 0.01, %v346_v36  ;;  %vm363_vm14 = vcmp.gt.f32.partialorder %v347_v39, 0.0 }
  0xf8   :  { %v404_v44 = vpack.c.bf16 %v393_v42, %v392_v38  ;;  %v379_v45 = vmul.f32 0.01, %v347_v39  ;;  %v423_v47 = vsel %vm415_vm2, %v401_v17, 0  ;;  %vm364_vm15 = vcmp.gt.f32.partialorder %v348_v40, 0.0 }
  0xf9   :  { %v394_v48 = vsel %vm362_vm13, %v346_v36, %v378_v43  ;;  %v380_v50 = vmul.f32 0.01, %v348_v40  ;;  %vm365_vm0 = vcmp.gt.f32.partialorder %v349_v46, 0.0  ;;  %v381_v52 = vmul.f32 0.01, %v349_v46 }
  0xfa   :  { %531 = vmatpush3.bf16.xpose.msra.mxu0 %v423_v47  ;;  %v395_v51 = vsel %vm363_vm14, %v347_v39, %v379_v45  ;;  %v319_v55 = vrot.slane %v255_v58, %v626_v24  ;;  %v350_v56 = vadd.f32 %v315_v33, %v649_v60  ;;  %v426_v1 = vsel %vm415_vm2, %v402_v29, 0 }
  0xfb   :  { %532 = vmatprep.subr.bf16.mxu0 %v558_v0  ;;  %v405_v53 = vpack.c.bf16 %v395_v51, %v394_v48  ;;  %v396_v54 = vsel %vm364_vm15, %v348_v40, %v380_v50  ;;  %v397_v57 = vsel %vm365_vm0, %v349_v46, %v381_v52  ;;  %v429_v24 = vsel %vm415_vm2, %v403_v41, 0 }
  0xfc   :  { %v406_v59 = vpack.c.bf16 %v397_v57, %v396_v54  ;;  %v351_v61 = vadd.f32 %v319_v55, %v649_v60  ;;  %vm366_vm1 = vcmp.gt.f32.partialorder %v350_v56, 0.0  ;;  %v382_v62 = vmul.f32 0.01, %v350_v56 }
  0xfd   :  { %v432_v49 = vsel %vm415_vm2, %v404_v44, 0  ;;  %v435_v58 = vsel %vm415_vm2, %v405_v53, 0 }
  0xfe   :  { %vm367_vm3 = vcmp.gt.f32.partialorder %v351_v61, 0.0  ;;  %v383_v63 = vmul.f32 0.01, %v351_v61  ;;  %v398_v2 = vsel %vm366_vm1, %v350_v56, %v382_v62  ;;  %v438_v60 = vsel %vm415_vm2, %v406_v59, 0 }
 0x100   :  { %v399_v3 = vsel %vm367_vm3, %v351_v61, %v383_v63 }
 0x101   :  { %v407_v4 = vpack.c.bf16 %v399_v3, %v398_v2 }
 0x102   :  { %533 = vmatpush3.bf16.xpose.msra.mxu0 %v426_v1 }
 0x103   :  { %534 = vmatprep.subr.bf16.mxu0 %v558_v0  ;;  %v441_v5 = vsel %vm415_vm2, %v407_v4, 0 }
 0x10a   :  { %535 = vmatpush3.bf16.xpose.msra.mxu0 %v429_v24 }
 0x10b   :  { %536 = vmatprep.subr.bf16.mxu0 %v558_v0 }
 0x112   :  { %537 = vmatpush3.bf16.xpose.msra.mxu0 %v432_v49 }
 0x113   :  { %538 = vmatprep.subr.bf16.mxu0 %v558_v0 }
 0x11a   :  { %539 = vmatpush3.bf16.xpose.msra.mxu0 %v435_v58 }
 0x11b   :  { %540 = vmatprep.subr.bf16.mxu0 %v558_v0 }
 0x122   :  { %541 = vmatpush3.bf16.xpose.msra.mxu0 %v438_v60 }
 0x123   :  { %542 = vmatprep.subr.bf16.mxu0 %v558_v0 }
 0x12a   :  { %543 = vmatpush3.bf16.xpose.msra.mxu0 %v441_v5 }
 0x131   :  { %545 = vmatmul.mubr.msk.bf16.vlgmr.msra.gmra.mrb[0].mxu0 %vm415_vm2, %v408_v6 }
 0x204   :  { %v477_v8 = vpop.f32.mrb[0].mxu0 }
 0x205   :  { %v478_v9 = vadd.f32 %v477_v8, %v413_v7  ;;  %v546_v10 = vpop.f32.mrb[1].mxu0 }
 0x206   :  { %v480_v11 = vpop.f32.mrb[2].mxu0 }
 0x207   :  { %483 = vst [vmem:[%s698_s6] sm:$0xff] %v478_v9  ;;  %v547_v12 = vpop.f32.mrb[3].mxu0 }

</bundles_post_ra>
